<compile_context>
chip_gen: v5e
topology: v5e:2x2
jax: 0.10.0
libtpu: 0.0.40
codegen_flags: <defaults>
</compile_context>

<pallas_src>
import functools

import jax
import jax.numpy as jnp
from jax import lax
from jax.experimental import pallas as pl
from jax.experimental.pallas import tpu as pltpu

_LANE = 128


def _cdiv(a, b):
    return -(-a // b)


def _round_up(v, m):
    return _cdiv(v, m) * m


def _gem_kernel(p_ref, flag_ref, x_ref, o_ref, *, eps, hw, hw_tile, n_hw_blocks):
    """One grid step: partial GeM reduction for a (rows_tile, hw_tile) block.

    p_ref, flag_ref : SMEM (1,) scalar-prefetch values: exponent p and the
                      integer fast-path selector (2/3/4, or 0 for general p).
    x_ref           : VMEM (rows_tile, hw_tile) input block.
    o_ref           : VMEM (1, rows_tile) f32 per-row sums, lane-dense,
                      resident across the HW ("arbitrary") grid axis.
    """
    multi_hw = n_hw_blocks > 1
    mask_hw_tail = multi_hw and (hw % hw_tile != 0)
    j = pl.program_id(1)

    if multi_hw:
        @pl.when(j == 0)
        def _():
            o_ref[...] = jnp.zeros_like(o_ref)

    x = jnp.maximum(x_ref[...].astype(jnp.float32), eps)        # clamp(min=eps)

    def _accumulate(xp):
        if mask_hw_tail:
            # Ragged last HW block: zero columns past the true extent so they
            # don't pollute valid rows' sums.  (Padded rows on the rows axis
            # need no mask -- their outputs are clipped on writeback.)
            col = lax.broadcasted_iota(jnp.int32, xp.shape, 1)
            xp = jnp.where(col < hw - j * hw_tile, xp, 0.0)
        # Lane-axis reduce, then store lane-dense.  (If profiling on v7x ever
        # shows the XLU lane-reduce as the binding slot for small HW, this can
        # be swapped for an MXU reduction: jnp.dot(xp, ones((hw_tile, 1))).)
        s = jnp.sum(xp, axis=-1).reshape(1, -1)                  # (1, rows_tile)
        if multi_hw:
            o_ref[...] += s
        else:
            o_ref[...] = s

    flag = flag_ref[0]

    @pl.when(flag == 3)            # module default p = 3: pure VPU multiplies
    def _():
        _accumulate(x * x * x)

    @pl.when(flag == 2)
    def _():
        _accumulate(x * x)

    @pl.when(flag == 4)
    def _():
        x2 = x * x
        _accumulate(x2 * x2)

    @pl.when(flag == 0)            # general (learned / non-integer) p: EUP path
    def _():
        # x**p = exp(p * log(x)); valid since x >= eps > 0.
        # TODO(synk): on v6e/v7x the EUP supports bf16 -- doing log/exp in bf16
        # with f32 sum accumulation would ~2x this path if accuracy allows.
        _accumulate(jnp.exp(p_ref[0] * jnp.log(x)))


def _vmem_capacity_bytes():
    try:
        cap = getattr(pltpu.get_tpu_info(), "vmem_capacity_bytes", None)
        if cap:
            return int(cap)
    except Exception:
        pass
    return 64 * 1024 * 1024        # conservative default (v7x per-core VMEM)


def _pick_tiles(rows, hw, itemsize, target_block_bytes):
    """Choose (rows_tile, hw_tile).

    rows_tile is either the full rows extent (small inputs) or a multiple of
    128 (legal sublane multiple for all dtypes and legal last dim of the
    lane-dense output block).  When several row tiles are needed, the count is
    rounded to an even number of near-equal tiles so the "parallel" axis
    balances across v7x's 2 TensorCores (harmless on 1-TC v5e/v6e).  The HW
    axis stays one full-extent block (contiguous HBM reads) unless that would
    blow the per-block budget, in which case it is split into 128-multiples
    and reduced over the "arbitrary" grid axis.
    """
    row_bytes = hw * itemsize
    if rows <= _LANE:
        rows_tile = rows                                    # full dim: always legal
    else:
        rt = max(_LANE, target_block_bytes // max(row_bytes, 1) // _LANE * _LANE)
        n_tiles = _round_up(max(2, _cdiv(rows, rt)), 2)     # even # of near-equal tiles
        rows_tile = min(_round_up(_cdiv(rows, n_tiles), _LANE),
                        _round_up(rows, _LANE))

    if hw <= _LANE or rows_tile * row_bytes <= 2 * target_block_bytes:
        hw_tile = hw                                        # full extent: contiguous DMA
    else:
        hw_tile = max(_LANE,
                      target_block_bytes // (rows_tile * itemsize) // _LANE * _LANE)
        hw_tile = min(hw_tile, hw)
    return rows_tile, hw_tile


def gem_pool(x, p, eps=1e-6):
    """GeM pooling. x: (N, C, H, W); p: shape-(1,) parameter. Returns (N, C, 1, 1)."""
    n, c, h, w = x.shape
    rows, hw = n * c, h * w
    x2 = x.reshape(rows, hw)                                # NCHW -> (rows, HW): free view
    # TODO(synk): when HW is not a multiple of 128 (e.g. 7x7 / 14x14 maps) the
    # lanes beyond HW are padding, so ~(1 - hw/round_up(hw,128)) of VPU lanes
    # idle and the HBM->VMEM DMA runs short strided rows; a host-side pad of the
    # HW axis to a 128-multiple plus an in-kernel lane mask would recover full
    # lane/DMA efficiency at the cost of one extra HBM pass.

    p_f32 = jnp.asarray(p, jnp.float32).reshape(1)
    p_int = jnp.round(p_f32)
    # Integer fast-path selector: 2/3/4 -> repeated multiplies, else 0 (EUP path).
    flag = jnp.where((p_f32 == p_int) & (p_int >= 2.0) & (p_int <= 4.0),
                     p_int, 0.0).astype(jnp.int32)

    vmem_cap = _vmem_capacity_bytes()
    # ~8 MiB blocks / 64 MiB limit on 128 MiB VMEM (v5e/v6e); ~4 MiB / 32 MiB on
    # 64 MiB VMEM (v7x).
    target_block_bytes = min(16 << 20, max(4 << 20, vmem_cap // 16))
    vmem_limit_bytes = min(96 << 20, max(32 << 20, vmem_cap // 2))

    rows_tile, hw_tile = _pick_tiles(rows, hw, x2.dtype.itemsize, target_block_bytes)
    n_row_blocks = _cdiv(rows, rows_tile)
    n_hw_blocks = _cdiv(hw, hw_tile)

    sums = pl.pallas_call(
        functools.partial(_gem_kernel, eps=float(eps), hw=hw, hw_tile=hw_tile,
                          n_hw_blocks=n_hw_blocks),
        out_shape=jax.ShapeDtypeStruct((1, rows), jnp.float32),
        grid_spec=pltpu.PrefetchScalarGridSpec(
            num_scalar_prefetch=2,                          # p, flag -> SMEM
            grid=(n_row_blocks, n_hw_blocks),               # rows parallel, HW reduce
            in_specs=[
                pl.BlockSpec((rows_tile, hw_tile), lambda i, j, p_sm, f_sm: (i, j)),
            ],
            out_specs=pl.BlockSpec((1, rows_tile), lambda i, j, p_sm, f_sm: (0, i)),
        ),
        compiler_params=pltpu.CompilerParams(
            dimension_semantics=("parallel", "arbitrary"),
            vmem_limit_bytes=vmem_limit_bytes,
        ),
    )(p_f32, flag, x2)

    # Finalize (mean ** (1/p)) over just N*C values as one fused XLA op.
    mean = sums.reshape(n, c) * (1.0 / hw)
    y = mean ** (1.0 / p_f32[0])
    return y.astype(x.dtype).reshape(n, c, 1, 1)


def gem_reference(x, p, eps=1e-6):
    """Pure-JAX reference matching the PyTorch module semantics."""
    xc = jnp.maximum(x.astype(jnp.float32), eps) ** p[0]
    m = jnp.mean(xc, axis=(-2, -1), keepdims=True)
    return (m ** (1.0 / p[0])).astype(x.dtype)


if __name__ == "__main__":
    key = jax.random.PRNGKey(0)
    # Small shapes consistent with the module: x is NCHW.
    N, C, H, W = 2, 4, 16, 16
    x = jax.random.normal(key, (N, C, H, W), dtype=jnp.float32)
    eps = 1e-6

    # Module default p = 3 (nn.Parameter(torch.ones(1) * 3)) -> VPU fast path.
    p3 = jnp.ones((1,), dtype=jnp.float32) * 3.0
    y3 = jax.block_until_ready(gem_pool(x, p3, eps=eps))
    assert y3.shape == (N, C, 1, 1), y3.shape
    y3_ref = gem_reference(x, p3, eps=eps)
    assert jnp.allclose(y3, y3_ref, rtol=1e-4, atol=1e-5), (
        f"p=3 max abs err {jnp.max(jnp.abs(y3 - y3_ref))}")

    # General (non-integer / learned) p -> EUP path.
    p25 = jnp.ones((1,), dtype=jnp.float32) * 2.5
    y25 = jax.block_until_ready(gem_pool(x, p25, eps=eps))
    y25_ref = gem_reference(x, p25, eps=eps)
    assert jnp.allclose(y25, y25_ref, rtol=1e-4, atol=1e-5), (
        f"p=2.5 max abs err {jnp.max(jnp.abs(y25 - y25_ref))}")

    # p = 2 integer fast path.
    p2 = jnp.ones((1,), dtype=jnp.float32) * 2.0
    y2 = jax.block_until_ready(gem_pool(x, p2, eps=eps))
    y2_ref = gem_reference(x, p2, eps=eps)
    assert jnp.allclose(y2, y2_ref, rtol=1e-4, atol=1e-5), (
        f"p=2 max abs err {jnp.max(jnp.abs(y2 - y2_ref))}")

    print("KERNEL_OK")
</pallas_src>

<mosaic_0001>
module attributes {stable_mosaic.version = 11 : i64} {
  func.func @_gem_kernel(%arg0: i32, %arg1: i32, %arg2: memref<1xf32, #tpu.memory_space<smem>>, %arg3: memref<1xi32, #tpu.memory_space<smem>>, %arg4: memref<8x256xf32, #tpu.memory_space<vmem>>, %arg5: memref<1x8xf32, #tpu.memory_space<vmem>>) attributes {dimension_semantics = [#tpu.dimension_semantics<parallel>, #tpu.dimension_semantics<arbitrary>], iteration_bounds = array<i64: 1, 1>, scalar_prefetch = 2 : i64, scratch_operands = 0 : i64, tpu.core_type = #tpu.core_type<tc>, window_params = [{transform_indices = @transform_0, window_bounds = array<i64: 8, 256>}, {transform_indices = @transform_1, window_bounds = array<i64: 1, 8>}]} {
    %c0 = arith.constant 0 : index
    %c0_0 = arith.constant 0 : index
    %0 = vector.load %arg4[%c0, %c0_0] : memref<8x256xf32, #tpu.memory_space<vmem>>, vector<8x256xf32>
    %cst = arith.constant 9.99999997E-7 : f32
    %1 = vector.broadcast %cst : f32 to vector<8x256xf32>
    %2 = arith.maximumf %0, %1 : vector<8x256xf32>
    %c0_1 = arith.constant 0 : index
    %3 = memref.load %arg3[%c0_1] : memref<1xi32, #tpu.memory_space<smem>>
    %c3_i32 = arith.constant 3 : i32
    %4 = arith.cmpi eq, %3, %c3_i32 : i32
    %5 = arith.extui %4 : i1 to i32
    %c0_i32 = arith.constant 0 : i32
    %6 = arith.cmpi ne, %5, %c0_i32 : i32
    scf.if %6 {
      %16 = arith.mulf %2, %2 : vector<8x256xf32>
      %17 = arith.mulf %16, %2 : vector<8x256xf32>
      %cst_6 = arith.constant dense<0.000000e+00> : vector<8xf32>
      %18 = vector.multi_reduction <add>, %17, %cst_6 [1] : vector<8x256xf32> to vector<8xf32>
      %19 = vector.shape_cast %18 : vector<8xf32> to vector<1x8xf32>
      %c0_7 = arith.constant 0 : index
      %c0_8 = arith.constant 0 : index
      %20 = vector.load %arg5[%c0_7, %c0_8] : memref<1x8xf32, #tpu.memory_space<vmem>>, vector<1x8xf32>
      tpu.vector_store %arg5[%c0_7, %c0_8], %19 {strides = array<i32>} : memref<1x8xf32, #tpu.memory_space<vmem>>, vector<1x8xf32>,
    } else {
    }
    %c2_i32 = arith.constant 2 : i32
    %7 = arith.cmpi eq, %3, %c2_i32 : i32
    %8 = arith.extui %7 : i1 to i32
    %c0_i32_2 = arith.constant 0 : i32
    %9 = arith.cmpi ne, %8, %c0_i32_2 : i32
    scf.if %9 {
      %16 = arith.mulf %2, %2 : vector<8x256xf32>
      %cst_6 = arith.constant dense<0.000000e+00> : vector<8xf32>
      %17 = vector.multi_reduction <add>, %16, %cst_6 [1] : vector<8x256xf32> to vector<8xf32>
      %18 = vector.shape_cast %17 : vector<8xf32> to vector<1x8xf32>
      %c0_7 = arith.constant 0 : index
      %c0_8 = arith.constant 0 : index
      %19 = vector.load %arg5[%c0_7, %c0_8] : memref<1x8xf32, #tpu.memory_space<vmem>>, vector<1x8xf32>
      tpu.vector_store %arg5[%c0_7, %c0_8], %18 {strides = array<i32>} : memref<1x8xf32, #tpu.memory_space<vmem>>, vector<1x8xf32>,
    } else {
    }
    %c4_i32 = arith.constant 4 : i32
    %10 = arith.cmpi eq, %3, %c4_i32 : i32
    %11 = arith.extui %10 : i1 to i32
    %c0_i32_3 = arith.constant 0 : i32
    %12 = arith.cmpi ne, %11, %c0_i32_3 : i32
    scf.if %12 {
      %16 = arith.mulf %2, %2 : vector<8x256xf32>
      %17 = arith.mulf %16, %16 : vector<8x256xf32>
      %cst_6 = arith.constant dense<0.000000e+00> : vector<8xf32>
      %18 = vector.multi_reduction <add>, %17, %cst_6 [1] : vector<8x256xf32> to vector<8xf32>
      %19 = vector.shape_cast %18 : vector<8xf32> to vector<1x8xf32>
      %c0_7 = arith.constant 0 : index
      %c0_8 = arith.constant 0 : index
      %20 = vector.load %arg5[%c0_7, %c0_8] : memref<1x8xf32, #tpu.memory_space<vmem>>, vector<1x8xf32>
      tpu.vector_store %arg5[%c0_7, %c0_8], %19 {strides = array<i32>} : memref<1x8xf32, #tpu.memory_space<vmem>>, vector<1x8xf32>,
    } else {
    }
    %c0_i32_4 = arith.constant 0 : i32
    %13 = arith.cmpi eq, %3, %c0_i32_4 : i32
    %14 = arith.extui %13 : i1 to i32
    %c0_i32_5 = arith.constant 0 : i32
    %15 = arith.cmpi ne, %14, %c0_i32_5 : i32
    scf.if %15 {
      %c0_6 = arith.constant 0 : index
      %16 = memref.load %arg2[%c0_6] : memref<1xf32, #tpu.memory_space<smem>>
      %17 = math.log %2 : vector<8x256xf32>
      %18 = vector.broadcast %16 : f32 to vector<8x256xf32>
      %19 = arith.mulf %18, %17 : vector<8x256xf32>
      %20 = math.exp %19 : vector<8x256xf32>
      %cst_7 = arith.constant dense<0.000000e+00> : vector<8xf32>
      %21 = vector.multi_reduction <add>, %20, %cst_7 [1] : vector<8x256xf32> to vector<8xf32>
      %22 = vector.shape_cast %21 : vector<8xf32> to vector<1x8xf32>
      %c0_8 = arith.constant 0 : index
      %c0_9 = arith.constant 0 : index
      %23 = vector.load %arg5[%c0_8, %c0_9] : memref<1x8xf32, #tpu.memory_space<vmem>>, vector<1x8xf32>
      tpu.vector_store %arg5[%c0_8, %c0_9], %22 {strides = array<i32>} : memref<1x8xf32, #tpu.memory_space<vmem>>, vector<1x8xf32>,
    } else {
    }
    return
  }
  func.func @transform_0(%arg0: i32, %arg1: i32, %arg2: memref<1xf32, #tpu.memory_space<smem>>, %arg3: memref<1xi32, #tpu.memory_space<smem>>) -> (i32, i32) {
    %c0_i32 = arith.constant 0 : i32
    return %arg0, %arg1 : i32, i32
  }
  func.func @transform_1(%arg0: i32, %arg1: i32, %arg2: memref<1xf32, #tpu.memory_space<smem>>, %arg3: memref<1xi32, #tpu.memory_space<smem>>) -> (i32, i32) {
    %c0_i32 = arith.constant 0 : i32
    %c0_i32_0 = arith.constant 0 : i32
    return %c0_i32, %arg0 : i32, i32
  }
}

</mosaic_0001>

<bundles_post_ra>
// kernel: tpu_custom_call.1
= control target key start
LH: loop header
LB: loop body
LE: loop exit
PB: predicated region body
PF: predicated region fallthrough
CT: control target
= control target key end

     0   :  { %s236_s0 = inlined_call_operand.<no memory space> [shape: f32[1], index: 0, kind: input, shape index: {}]   ;;  %s237_s1 = inlined_call_operand.<no memory space> [shape: s32[1], index: 1, kind: input, shape index: {}]   ;;  %s238_s2 = inlined_call_operand.hbm [shape: f32[8,256], index: 2, kind: input, shape index: {}]   ;;  %s239_s3 = inlined_call_operand.hbm [shape: f32[1,8], index: 3, kind: output, shape index: {}]  }
   0x1   :  { %8 = sst [smem:[#allocation3]] %s236_s0 }
   0x2   :  { %10 = vsyncpa [#allocation6], 0 }
   0x3   :  { %11 = vsyncpa [#allocation7], 0  ;;  %s17_s16 = sshll.u32 %s238_s2, 4  ;;  %s193_s17 = smov [#allocation5]   ;;  %s18_s16 = int_to_ptr.hbm [resolvable:$true] %s17_s16 }
   0x4   :  { %s19_s18 = sshll.u32 %s193_s17, 4  ;;  %s20_s18 = int_to_ptr.vmem [resolvable:$true] %s19_s18 }
   0x5   :  { %22 = dma.hbm_to_vmem [thread:$0]  %s18_s16, 256, %s20_s18, [#allocation6]  }
   0x6   :  { %189 = dma.done.wait [#allocation6], 256  }
   0x7   :  { %190 = vsyncadd [#allocation6], 4294967040  ;;  %v27_v0 = vld [vmem:[#allocation5] sm:$0xff]  ;;  %v28_v1 = vld [vmem:[#allocation5 + $0x8] sm:$0xff]  ;;  %p127_p0 = scmp.ne.s32.totalorder %s237_s1, 3 }
   0x8   :  { %v29_v2 = vmax.f32 %v27_v0, 1e-06  ;;  %v30_v3 = vmax.f32 %v28_v1, 1e-06 }
   0x9   :  { %35 = sbr.rel (%p127_p0) target bundleno = 139 (0x8b), region = 13 }
   0xe   :  { %v36_v4 = vmul.f32 %v29_v2, %v29_v2  ;;  %v37_v5 = vmul.f32 %v30_v3, %v30_v3  ;;  %v44_v9 = vlaneseq  ;;  %vm48_vm0 = vcmask 57344  }
  0x10   :  { %v38_v6 = vmul.f32 %v36_v4, %v29_v2  ;;  %v39_v7 = vmul.f32 %v37_v5, %v30_v3  ;;  %v45_v10 = vand.u32 127, %v44_v9 }
  0x12   :  { %v40_v8 = vadd.f32 %v39_v7, %v38_v6 }
  0x14   :  { %41 = vadd.xlane.f32.xlu0 %v40_v8 }
  0x87   :  { %v42_v11 = vpop.xlane.xlu0 %41 }
  0x88   :  { %v46_v12 = vperm.slane %v42_v11, %v45_v10 }
  0x8a   :  { %49 = vst.msk [vmem:[#allocation8] sm:$0x1] %vm48_vm0, %v46_v12 }
  0x8b PF:  { %p128_p1 = scmp.ne.s32.totalorder %s237_s1, 2 }
  0x8d   :  { %53 = sbr.rel (%p128_p1) target bundleno = 269 (0x10d), region = 17 }
  0x92   :  { %v54_v13 = vmul.f32 %v29_v2, %v29_v2  ;;  %v55_v14 = vmul.f32 %v30_v3, %v30_v3  ;;  %v60_v16 = vlaneseq  ;;  %vm64_vm1 = vcmask 57344  }
  0x94   :  { %v56_v15 = vadd.f32 %v55_v14, %v54_v13  ;;  %v61_v17 = vand.u32 127, %v60_v16 }
  0x96   :  { %57 = vadd.xlane.f32.xlu0 %v56_v15 }
 0x109   :  { %v58_v18 = vpop.xlane.xlu0 %57 }
 0x10a   :  { %v62_v19 = vperm.slane %v58_v18, %v61_v17 }
 0x10c   :  { %65 = vst.msk [vmem:[#allocation8] sm:$0x1] %vm64_vm1, %v62_v19 }
 0x10d PF:  { %p129_p2 = scmp.ne.s32.totalorder %s237_s1, 4 }
 0x10f   :  { %69 = sbr.rel (%p129_p2) target bundleno = 401 (0x191), region = 21 }
 0x114   :  { %v70_v20 = vmul.f32 %v29_v2, %v29_v2  ;;  %v71_v21 = vmul.f32 %v30_v3, %v30_v3  ;;  %v78_v25 = vlaneseq  ;;  %vm82_vm2 = vcmask 57344  }
 0x116   :  { %v72_v22 = vmul.f32 %v70_v20, %v70_v20  ;;  %v73_v23 = vmul.f32 %v71_v21, %v71_v21  ;;  %v79_v26 = vand.u32 127, %v78_v25 }
 0x118   :  { %v74_v24 = vadd.f32 %v73_v23, %v72_v22 }
 0x11a   :  { %75 = vadd.xlane.f32.xlu0 %v74_v24 }
 0x18d   :  { %v76_v27 = vpop.xlane.xlu0 %75 }
 0x18e   :  { %v80_v28 = vperm.slane %v76_v27, %v79_v26 }
 0x190   :  { %83 = vst.msk [vmem:[#allocation8] sm:$0x1] %vm82_vm2, %v80_v28 }
 0x191 PF:  { %p130_p3 = scmp.ne.s32.totalorder %s237_s1, 0 }
 0x192   :  { %s88_s25 = sld [smem:[#allocation3]] (!%p130_p3) }
 0x193   :  { %87 = sbr.rel (%p130_p3) target bundleno = 550 (0x226), region = 25 }
 0x198   :  { %133 = vlog2.f32 %v29_v2  ;;  %v93_v30 = vstv %s88_s25  ;;  %v104_v41 = vlaneseq  ;;  %vm108_vm3 = vcmask 57344  }
 0x199   :  { %135 = vlog2.f32 %v30_v3 }
 0x19a   :  { %v105_v42 = vand.u32 127, %v104_v41 }
 0x19e   :  { %v134_v29 = vpop.eup %133 }
 0x19f   :  { %v136_v31 = vpop.eup %135  ;;  %v90_v32 = vmul.f32 0.6931472, %v134_v29 }
 0x1a0   :  { %v92_v33 = vmul.f32 0.6931472, %v136_v31 }
 0x1a1   :  { %v94_v34 = vmul.f32 %v93_v30, %v90_v32 }
 0x1a2   :  { %v95_v35 = vmul.f32 %v93_v30, %v92_v33 }
 0x1a3   :  { %v96_v36 = vmul.f32 1.442695, %v94_v34 }
 0x1a4   :  { %v98_v37 = vmul.f32 1.442695, %v95_v35 }
 0x1a5   :  { %137 = vpow2.f32 %v96_v36 }
 0x1a6   :  { %139 = vpow2.f32 %v98_v37 }
 0x1ab   :  { %v138_v38 = vpop.eup %137 }
 0x1ac   :  { %v140_v39 = vpop.eup %139 }
 0x1ad   :  { %v100_v40 = vadd.f32 %v140_v39, %v138_v38 }
 0x1af   :  { %101 = vadd.xlane.f32.xlu0 %v100_v40 }
 0x222   :  { %v102_v43 = vpop.xlane.xlu0 %101 }
 0x223   :  { %v106_v44 = vperm.slane %v102_v43, %v105_v42 }
 0x225   :  { %109 = vst.msk [vmem:[#allocation8] sm:$0x1] %vm108_vm3, %v106_v44 }
 0x226 PF:  { %s117_s27 = sshll.u32 %s239_s3, 4  ;;  %s194_s28 = smov [#allocation8]   ;;  %s118_s27 = int_to_ptr.hbm [resolvable:$true] %s117_s27 }
 0x227   :  { %s115_s29 = sshll.u32 %s194_s28, 4  ;;  %s116_s29 = int_to_ptr.vmem [resolvable:$true] %s115_s29 }
 0x228   :  { %120 = dma.vmem_to_hbm [thread:$0]  %s116_s29, 16, %s118_s27, [#allocation7]  }
 0x229   :  { %191 = dma.done.wait [#allocation7], 16  }
 0x22a   :  { %192 = vsyncadd [#allocation7], 4294967280 }
 0x22b   :  { %125 = vsyncpa [#allocation6], 1 }
 0x22c   :  { %126 = vsyncpa [#allocation7], 1 }

</bundles_post_ra>
